<compile_context>
chip_gen: v6e
topology: v6e:2x2x1
jax: 0.10.0
libtpu: 0.0.40
codegen_flags: <defaults>
</compile_context>

<pallas_src>
import functools
import numpy as np
import jax
import jax.numpy as jnp
from jax.experimental import pallas as pl
from jax.experimental.pallas import tpu as pltpu


# ------------------------- fused per-series kernel -------------------------

def _beat_block_kernel(x_ref, w_ma_ref,
                       w_qkv_ref, b_qkv_ref,
                       w_out_ref, b_out_ref,
                       w_pp_ref, b_pp_ref,
                       w_sp_ref, b_sp_ref,
                       w_sv_ref, b_sv_ref,
                       o_ref, *, num_heads):
    f32, bf16 = jnp.float32, jnp.bfloat16
    W = w_ma_ref.shape[0]          # lookback_w == MHA embed dim == SGU width
    W2 = W // 2
    hd = W // num_heads
    scale = 1.0 / float(np.sqrt(hd))

    xb = x_ref[0]                  # (B, W) bf16 rows for this series
    x = xb.astype(f32)

    # series_decomp: edge-replicated moving average along the lookback axis,
    # realised as one bf16 MXU matmul (W, W) with f32 accumulation.
    # TODO(synk): if the MXU becomes the saturated slot at production W,
    # replace this dense matmul with kernel_size pltpu.roll shifts + adds.
    mean = jnp.dot(xb, w_ma_ref[...], preferred_element_type=f32)    # (B, W)
    seasonal = x - mean
    trend = mean

    # Fused q/k/v projection of the seasonal component: (B, W) @ (W, 3W).
    qkv = jnp.dot(seasonal.astype(bf16), w_qkv_ref[...],
                  preferred_element_type=f32) + b_qkv_ref[...]

    # Multi-head self-attention over the B axis of this series only:
    # no mask needed — the per-series grid makes attention block-diagonal.
    # TODO(synk): at production sizes batch the heads (single dot over a
    # (heads, B, hd) layout, or 128-aligned hd) instead of sub-128-lane slices.
    ctx_heads = []
    for h in range(num_heads):
        lo = h * hd
        qh = qkv[:, lo:lo + hd].astype(bf16)
        kh = qkv[:, W + lo:W + lo + hd].astype(bf16)
        vh = qkv[:, 2 * W + lo:2 * W + lo + hd].astype(bf16)
        s = jax.lax.dot_general(qh, kh, (((1,), (1,)), ((), ())),
                                preferred_element_type=f32) * scale   # (B, B)
        s = s - jnp.max(s, axis=-1, keepdims=True)
        p = jnp.exp(s)
        p = p * pl.reciprocal(jnp.sum(p, axis=-1, keepdims=True), approx=True)
        ctx_heads.append(jnp.dot(p.astype(bf16), vh,
                                 preferred_element_type=f32))
    ctx = jnp.concatenate(ctx_heads, axis=-1)                         # (B, W)

    # MHA out_proj -> process_p (cell_dropout / attention dropout: eval identity).
    a = jnp.dot(ctx.astype(bf16), w_out_ref[...],
                preferred_element_type=f32) + b_out_ref[...]
    a = jnp.dot(a.astype(bf16), w_pp_ref[...],
                preferred_element_type=f32) + b_pp_ref[...]

    # SpatialGatingUnit on the trend component.
    u = trend[:, :W2]
    vv = jnp.dot(trend[:, W2:].astype(bf16), w_sp_ref[...],
                 preferred_element_type=f32) + b_sp_ref[...]
    sg = jnp.dot((u * vv).astype(bf16), w_sv_ref[...],
                 preferred_element_type=f32) + b_sv_ref[...]

    # expansion_f rows for this series.
    # TODO(synk): at production sizes pad the output lane dim (W) to a multiple
    # of 128 to avoid masked vst.msk partial stores (slice back in the wrapper).
    o_ref[0] = a + sg


# ------------------------- constant builders -------------------------

def _moving_avg_matrix(W, kernel_size):
    # Autoformer-style edge-replicated moving average along the lookback axis,
    # expressed as a right-multiplied (W, W) matrix: mean = x @ M.
    assert kernel_size % 2 == 1, "series_decomp padding assumes an odd kernel_size"
    pad = (kernel_size - 1) // 2
    m = np.zeros((W, W), np.float32)
    for j in range(W):
        for t in range(kernel_size):
            i = min(max(j + t - pad, 0), W - 1)
            m[i, j] += 1.0 / kernel_size
    return jnp.asarray(m)


# ------------------------- parameters -------------------------

def _init_linear(key, out_f, in_f):
    kw, kb = jax.random.split(key)
    bound = 1.0 / float(np.sqrt(in_f))
    w = jax.random.uniform(kw, (out_f, in_f), jnp.float32, -bound, bound)
    b = jax.random.uniform(kb, (out_f,), jnp.float32, -bound, bound)
    return w, b


def init_params(key, lookback_w, num_heads, kernel_size=25):
    W = lookback_w
    assert W % num_heads == 0 and W % 2 == 0
    ks = jax.random.split(key, 7)
    wq, bq = _init_linear(ks[0], W, W)            # MHA in_proj (q)
    wk, bk = _init_linear(ks[1], W, W)            # MHA in_proj (k)
    wv, bv = _init_linear(ks[2], W, W)            # MHA in_proj (v)
    wo, bo = _init_linear(ks[3], W, W)            # MHA out_proj
    wp, bp = _init_linear(ks[4], W, W)            # process_p
    ws, bs = _init_linear(ks[5], W // 2, W // 2)  # sgu.proj
    wv2, bv2 = _init_linear(ks[6], W, W // 2)     # sgu.proj_v

    bf16 = jnp.bfloat16
    return {
        # Weights pre-transposed to (in, out), q/k/v fused, all MXU weights bf16.
        'w_ma': _moving_avg_matrix(W, kernel_size).astype(bf16),
        'w_qkv': jnp.concatenate([wq.T, wk.T, wv.T], axis=1).astype(bf16),  # (W, 3W)
        'b_qkv': jnp.concatenate([bq, bk, bv]).reshape(1, 3 * W),
        'w_out': wo.T.astype(bf16), 'b_out': bo.reshape(1, W),
        'w_pp': wp.T.astype(bf16),  'b_pp': bp.reshape(1, W),
        'w_sp': ws.T.astype(bf16),  'b_sp': bs.reshape(1, W // 2),
        'w_sv': wv2.T.astype(bf16), 'b_sv': bv2.reshape(1, W),
        # TODO(synk): x_linear / process_t exist in the PyTorch module but are
        # never used in forward, so they carry no parameters here.
        # TODO(synk): on v7x the projection weights could be fp8 with
        # per-channel scales (native MXU path); keep bf16 on v5e/v6e.
    }


# ------------------------- module forward -------------------------

def beat_block_forward(params, x_expansion, x=None, *, num_heads=4):
    # x_expansion: (B, W, N)  ->  expansion_f: (B, W, N).  `x` is unused by
    # the PyTorch BEAT_Block.forward, kept only for signature parity.
    del x
    B, W, N = x_expansion.shape

    # Series-major 3D layout (N, B, W): each grid step owns one series, so its
    # attention batch is exactly the (B, W) tile and no mask is needed.
    # Pre-cast to bf16 to halve the HBM->VMEM activation stream.
    xs = jnp.transpose(x_expansion, (2, 0, 1)).astype(jnp.bfloat16)

    kernel = functools.partial(_beat_block_kernel, num_heads=num_heads)

    def wspec(arr):
        nd = arr.ndim
        return pl.BlockSpec(arr.shape, lambda n, _nd=nd: (0,) * _nd)

    in_specs = [
        pl.BlockSpec((1, B, W), lambda n: (n, 0, 0)),   # x (per-series tile)
        wspec(params['w_ma']),
        wspec(params['w_qkv']), wspec(params['b_qkv']),
        wspec(params['w_out']), wspec(params['b_out']),
        wspec(params['w_pp']),  wspec(params['b_pp']),
        wspec(params['w_sp']),  wspec(params['b_sp']),
        wspec(params['w_sv']),  wspec(params['b_sv']),
    ]

    out3 = pl.pallas_call(
        kernel,
        out_shape=jax.ShapeDtypeStruct((N, B, W), jnp.float32),
        grid_spec=pltpu.PrefetchScalarGridSpec(
            num_scalar_prefetch=0,
            grid=(N,),
            in_specs=in_specs,
            out_specs=pl.BlockSpec((1, B, W), lambda n: (n, 0, 0)),
        ),
        compiler_params=pltpu.CompilerParams(
            dimension_semantics=("parallel",),          # megacore on v7x
            vmem_limit_bytes=48 * 1024 * 1024),
        # TODO(synk): for very small B*W, pack several series per grid step to
        # amortize the ~0.35 us per-step overhead.
    )(xs, params['w_ma'],
      params['w_qkv'], params['b_qkv'],
      params['w_out'], params['b_out'],
      params['w_pp'], params['b_pp'],
      params['w_sp'], params['b_sp'],
      params['w_sv'], params['b_sv'])

    expansion_f = jnp.transpose(out3, (1, 2, 0))        # (B, W, N)
    return expansion_f, 0                               # matches (expansion_f, 0)
    # TODO(synk): dropout layers are eval-mode identity (deterministic forward).


# ------------------------- main -------------------------

if __name__ == "__main__":
    B = 4           # batch (MHA attends across this axis; batch_first=False)
    W = 16          # lookback_w = MHA embed dim = SGU width (divisible by 4, even)
    N = 6           # num_series
    NUM_HEADS = 4   # fixed in BEAT_Block.__init__
    KERNEL_SIZE = 25  # fixed in BEAT_Block.__init__

    key = jax.random.PRNGKey(0)
    kx, kp = jax.random.split(key)
    x_expansion = jax.random.normal(kx, (B, W, N), dtype=jnp.float32)
    x_unused = jnp.zeros_like(x_expansion)   # second forward arg, never used
    params = init_params(kp, W, NUM_HEADS, KERNEL_SIZE)

    out, _zero = beat_block_forward(params, x_expansion, x_unused,
                                    num_heads=NUM_HEADS)
    out = jax.block_until_ready(out)
    assert out.shape == (B, W, N), out.shape
    assert bool(jnp.all(jnp.isfinite(out)))
    print("KERNEL_OK")
</pallas_src>

<mosaic_0001>
module attributes {stable_mosaic.version = 11 : i64} {
  func.func @_beat_block_kernel(%arg0: i32, %arg1: memref<1x4x16xbf16, #tpu.memory_space<vmem>>, %arg2: memref<16x16xbf16, #tpu.memory_space<vmem>>, %arg3: memref<16x48xbf16, #tpu.memory_space<vmem>>, %arg4: memref<1x48xf32, #tpu.memory_space<vmem>>, %arg5: memref<16x16xbf16, #tpu.memory_space<vmem>>, %arg6: memref<1x16xf32, #tpu.memory_space<vmem>>, %arg7: memref<16x16xbf16, #tpu.memory_space<vmem>>, %arg8: memref<1x16xf32, #tpu.memory_space<vmem>>, %arg9: memref<8x8xbf16, #tpu.memory_space<vmem>>, %arg10: memref<1x8xf32, #tpu.memory_space<vmem>>, %arg11: memref<8x16xbf16, #tpu.memory_space<vmem>>, %arg12: memref<1x16xf32, #tpu.memory_space<vmem>>, %arg13: memref<1x4x16xf32, #tpu.memory_space<vmem>>) attributes {dimension_semantics = [#tpu.dimension_semantics<parallel>], iteration_bounds = array<i64: 6>, scalar_prefetch = 0 : i64, scratch_operands = 0 : i64, tpu.core_type = #tpu.core_type<tc>, window_params = [{transform_indices = @transform_0, window_bounds = array<i64: 1, 4, 16>}, {pipeline_mode = #tpu.pipeline_mode<synchronous>, transform_indices = @transform_1, window_bounds = array<i64: 16, 16>}, {pipeline_mode = #tpu.pipeline_mode<synchronous>, transform_indices = @transform_2, window_bounds = array<i64: 16, 48>}, {pipeline_mode = #tpu.pipeline_mode<synchronous>, transform_indices = @transform_3, window_bounds = array<i64: 1, 48>}, {pipeline_mode = #tpu.pipeline_mode<synchronous>, transform_indices = @transform_4, window_bounds = array<i64: 16, 16>}, {pipeline_mode = #tpu.pipeline_mode<synchronous>, transform_indices = @transform_5, window_bounds = array<i64: 1, 16>}, {pipeline_mode = #tpu.pipeline_mode<synchronous>, transform_indices = @transform_6, window_bounds = array<i64: 16, 16>}, {pipeline_mode = #tpu.pipeline_mode<synchronous>, transform_indices = @transform_7, window_bounds = array<i64: 1, 16>}, {pipeline_mode = #tpu.pipeline_mode<synchronous>, transform_indices = @transform_8, window_bounds = array<i64: 8, 8>}, {pipeline_mode = #tpu.pipeline_mode<synchronous>, transform_indices = @transform_9, window_bounds = array<i64: 1, 8>}, {pipeline_mode = #tpu.pipeline_mode<synchronous>, transform_indices = @transform_10, window_bounds = array<i64: 8, 16>}, {pipeline_mode = #tpu.pipeline_mode<synchronous>, transform_indices = @transform_11, window_bounds = array<i64: 1, 16>}, {transform_indices = @transform_12, window_bounds = array<i64: 1, 4, 16>}]} {
    %c0 = arith.constant 0 : index
    %c0_0 = arith.constant 0 : index
    %c0_1 = arith.constant 0 : index
    %0 = vector.load %arg1[%c0, %c0_0, %c0_1] : memref<1x4x16xbf16, #tpu.memory_space<vmem>>, vector<1x4x16xbf16>
    %1 = vector.shape_cast %0 : vector<1x4x16xbf16> to vector<4x16xbf16>
    %2 = arith.extf %1 : vector<4x16xbf16> to vector<4x16xf32>
    %c0_2 = arith.constant 0 : index
    %c0_3 = arith.constant 0 : index
    %3 = vector.load %arg2[%c0_2, %c0_3] : memref<16x16xbf16, #tpu.memory_space<vmem>>, vector<16x16xbf16>
    %cst = arith.constant dense<0.000000e+00> : vector<4x16xf32>
    %4 = tpu.matmul %1, %3, %cst {dimension_numbers = #tpu.dot_dimension_numbers<[1], [0], [0], [1], [0, 0, 1, 1], [], []>} : vector<4x16xbf16>, vector<16x16xbf16>, vector<4x16xf32> -> vector<4x16xf32>
    %5 = arith.subf %2, %4 : vector<4x16xf32>
    %6 = arith.truncf %5 : vector<4x16xf32> to vector<4x16xbf16>
    %c0_4 = arith.constant 0 : index
    %c0_5 = arith.constant 0 : index
    %7 = vector.load %arg3[%c0_4, %c0_5] : memref<16x48xbf16, #tpu.memory_space<vmem>>, vector<16x48xbf16>
    %cst_6 = arith.constant dense<0.000000e+00> : vector<4x48xf32>
    %8 = tpu.matmul %6, %7, %cst_6 {dimension_numbers = #tpu.dot_dimension_numbers<[1], [0], [0], [1], [0, 0, 1, 1], [], []>} : vector<4x16xbf16>, vector<16x48xbf16>, vector<4x48xf32> -> vector<4x48xf32>
    %c0_7 = arith.constant 0 : index
    %c0_8 = arith.constant 0 : index
    %9 = vector.load %arg4[%c0_7, %c0_8] : memref<1x48xf32, #tpu.memory_space<vmem>>, vector<1x48xf32>
    %10 = vector.broadcast %9 : vector<1x48xf32> to vector<4x48xf32>
    %11 = arith.addf %8, %10 : vector<4x48xf32>
    %12 = vector.extract_strided_slice %11 {offsets = [0, 0], sizes = [4, 4], strides = [1, 1]} : vector<4x48xf32> to vector<4x4xf32>
    %13 = arith.truncf %12 : vector<4x4xf32> to vector<4x4xbf16>
    %14 = vector.extract_strided_slice %11 {offsets = [0, 16], sizes = [4, 4], strides = [1, 1]} : vector<4x48xf32> to vector<4x4xf32>
    %15 = arith.truncf %14 : vector<4x4xf32> to vector<4x4xbf16>
    %16 = vector.extract_strided_slice %11 {offsets = [0, 32], sizes = [4, 4], strides = [1, 1]} : vector<4x48xf32> to vector<4x4xf32>
    %17 = arith.truncf %16 : vector<4x4xf32> to vector<4x4xbf16>
    %cst_9 = arith.constant dense<0.000000e+00> : vector<4x4xf32>
    %18 = tpu.matmul %13, %15, %cst_9 {dimension_numbers = #tpu.dot_dimension_numbers<[1], [1], [0], [0], [0, 0, 1, 0], [], []>} : vector<4x4xbf16>, vector<4x4xbf16>, vector<4x4xf32> -> vector<4x4xf32>
    %cst_10 = arith.constant 5.000000e-01 : f32
    %19 = vector.broadcast %cst_10 : f32 to vector<4x4xf32>
    %20 = arith.mulf %18, %19 : vector<4x4xf32>
    %cst_11 = arith.constant dense<0xFF800000> : vector<4xf32>
    %21 = vector.multi_reduction <maximumf>, %20, %cst_11 [1] : vector<4x4xf32> to vector<4xf32>
    %22 = vector.shape_cast %21 : vector<4xf32> to vector<4x1xf32>
    %23 = vector.broadcast %22 : vector<4x1xf32> to vector<4x4xf32>
    %24 = arith.subf %20, %23 : vector<4x4xf32>
    %25 = math.exp %24 : vector<4x4xf32>
    %cst_12 = arith.constant dense<0.000000e+00> : vector<4xf32>
    %26 = vector.multi_reduction <add>, %25, %cst_12 [1] : vector<4x4xf32> to vector<4xf32>
    %27 = vector.shape_cast %26 : vector<4xf32> to vector<4x1xf32>
    %28 = tpu.reciprocal %27 {approx = true} : vector<4x1xf32> -> vector<4x1xf32>
    %29 = vector.broadcast %28 : vector<4x1xf32> to vector<4x4xf32>
    %30 = arith.mulf %25, %29 : vector<4x4xf32>
    %31 = arith.truncf %30 : vector<4x4xf32> to vector<4x4xbf16>
    %cst_13 = arith.constant dense<0.000000e+00> : vector<4x4xf32>
    %32 = tpu.matmul %31, %17, %cst_13 {dimension_numbers = #tpu.dot_dimension_numbers<[1], [0], [0], [1], [0, 0, 1, 1], [], []>} : vector<4x4xbf16>, vector<4x4xbf16>, vector<4x4xf32> -> vector<4x4xf32>
    %33 = vector.extract_strided_slice %11 {offsets = [0, 4], sizes = [4, 4], strides = [1, 1]} : vector<4x48xf32> to vector<4x4xf32>
    %34 = arith.truncf %33 : vector<4x4xf32> to vector<4x4xbf16>
    %35 = vector.extract_strided_slice %11 {offsets = [0, 20], sizes = [4, 4], strides = [1, 1]} : vector<4x48xf32> to vector<4x4xf32>
    %36 = arith.truncf %35 : vector<4x4xf32> to vector<4x4xbf16>
    %37 = vector.extract_strided_slice %11 {offsets = [0, 36], sizes = [4, 4], strides = [1, 1]} : vector<4x48xf32> to vector<4x4xf32>
    %38 = arith.truncf %37 : vector<4x4xf32> to vector<4x4xbf16>
    %cst_14 = arith.constant dense<0.000000e+00> : vector<4x4xf32>
    %39 = tpu.matmul %34, %36, %cst_14 {dimension_numbers = #tpu.dot_dimension_numbers<[1], [1], [0], [0], [0, 0, 1, 0], [], []>} : vector<4x4xbf16>, vector<4x4xbf16>, vector<4x4xf32> -> vector<4x4xf32>
    %cst_15 = arith.constant 5.000000e-01 : f32
    %40 = vector.broadcast %cst_15 : f32 to vector<4x4xf32>
    %41 = arith.mulf %39, %40 : vector<4x4xf32>
    %cst_16 = arith.constant dense<0xFF800000> : vector<4xf32>
    %42 = vector.multi_reduction <maximumf>, %41, %cst_16 [1] : vector<4x4xf32> to vector<4xf32>
    %43 = vector.shape_cast %42 : vector<4xf32> to vector<4x1xf32>
    %44 = vector.broadcast %43 : vector<4x1xf32> to vector<4x4xf32>
    %45 = arith.subf %41, %44 : vector<4x4xf32>
    %46 = math.exp %45 : vector<4x4xf32>
    %cst_17 = arith.constant dense<0.000000e+00> : vector<4xf32>
    %47 = vector.multi_reduction <add>, %46, %cst_17 [1] : vector<4x4xf32> to vector<4xf32>
    %48 = vector.shape_cast %47 : vector<4xf32> to vector<4x1xf32>
    %49 = tpu.reciprocal %48 {approx = true} : vector<4x1xf32> -> vector<4x1xf32>
    %50 = vector.broadcast %49 : vector<4x1xf32> to vector<4x4xf32>
    %51 = arith.mulf %46, %50 : vector<4x4xf32>
    %52 = arith.truncf %51 : vector<4x4xf32> to vector<4x4xbf16>
    %cst_18 = arith.constant dense<0.000000e+00> : vector<4x4xf32>
    %53 = tpu.matmul %52, %38, %cst_18 {dimension_numbers = #tpu.dot_dimension_numbers<[1], [0], [0], [1], [0, 0, 1, 1], [], []>} : vector<4x4xbf16>, vector<4x4xbf16>, vector<4x4xf32> -> vector<4x4xf32>
    %54 = vector.extract_strided_slice %11 {offsets = [0, 8], sizes = [4, 4], strides = [1, 1]} : vector<4x48xf32> to vector<4x4xf32>
    %55 = arith.truncf %54 : vector<4x4xf32> to vector<4x4xbf16>
    %56 = vector.extract_strided_slice %11 {offsets = [0, 24], sizes = [4, 4], strides = [1, 1]} : vector<4x48xf32> to vector<4x4xf32>
    %57 = arith.truncf %56 : vector<4x4xf32> to vector<4x4xbf16>
    %58 = vector.extract_strided_slice %11 {offsets = [0, 40], sizes = [4, 4], strides = [1, 1]} : vector<4x48xf32> to vector<4x4xf32>
    %59 = arith.truncf %58 : vector<4x4xf32> to vector<4x4xbf16>
    %cst_19 = arith.constant dense<0.000000e+00> : vector<4x4xf32>
    %60 = tpu.matmul %55, %57, %cst_19 {dimension_numbers = #tpu.dot_dimension_numbers<[1], [1], [0], [0], [0, 0, 1, 0], [], []>} : vector<4x4xbf16>, vector<4x4xbf16>, vector<4x4xf32> -> vector<4x4xf32>
    %cst_20 = arith.constant 5.000000e-01 : f32
    %61 = vector.broadcast %cst_20 : f32 to vector<4x4xf32>
    %62 = arith.mulf %60, %61 : vector<4x4xf32>
    %cst_21 = arith.constant dense<0xFF800000> : vector<4xf32>
    %63 = vector.multi_reduction <maximumf>, %62, %cst_21 [1] : vector<4x4xf32> to vector<4xf32>
    %64 = vector.shape_cast %63 : vector<4xf32> to vector<4x1xf32>
    %65 = vector.broadcast %64 : vector<4x1xf32> to vector<4x4xf32>
    %66 = arith.subf %62, %65 : vector<4x4xf32>
    %67 = math.exp %66 : vector<4x4xf32>
    %cst_22 = arith.constant dense<0.000000e+00> : vector<4xf32>
    %68 = vector.multi_reduction <add>, %67, %cst_22 [1] : vector<4x4xf32> to vector<4xf32>
    %69 = vector.shape_cast %68 : vector<4xf32> to vector<4x1xf32>
    %70 = tpu.reciprocal %69 {approx = true} : vector<4x1xf32> -> vector<4x1xf32>
    %71 = vector.broadcast %70 : vector<4x1xf32> to vector<4x4xf32>
    %72 = arith.mulf %67, %71 : vector<4x4xf32>
    %73 = arith.truncf %72 : vector<4x4xf32> to vector<4x4xbf16>
    %cst_23 = arith.constant dense<0.000000e+00> : vector<4x4xf32>
    %74 = tpu.matmul %73, %59, %cst_23 {dimension_numbers = #tpu.dot_dimension_numbers<[1], [0], [0], [1], [0, 0, 1, 1], [], []>} : vector<4x4xbf16>, vector<4x4xbf16>, vector<4x4xf32> -> vector<4x4xf32>
    %75 = vector.extract_strided_slice %11 {offsets = [0, 12], sizes = [4, 4], strides = [1, 1]} : vector<4x48xf32> to vector<4x4xf32>
    %76 = arith.truncf %75 : vector<4x4xf32> to vector<4x4xbf16>
    %77 = vector.extract_strided_slice %11 {offsets = [0, 28], sizes = [4, 4], strides = [1, 1]} : vector<4x48xf32> to vector<4x4xf32>
    %78 = arith.truncf %77 : vector<4x4xf32> to vector<4x4xbf16>
    %79 = vector.extract_strided_slice %11 {offsets = [0, 44], sizes = [4, 4], strides = [1, 1]} : vector<4x48xf32> to vector<4x4xf32>
    %80 = arith.truncf %79 : vector<4x4xf32> to vector<4x4xbf16>
    %cst_24 = arith.constant dense<0.000000e+00> : vector<4x4xf32>
    %81 = tpu.matmul %76, %78, %cst_24 {dimension_numbers = #tpu.dot_dimension_numbers<[1], [1], [0], [0], [0, 0, 1, 0], [], []>} : vector<4x4xbf16>, vector<4x4xbf16>, vector<4x4xf32> -> vector<4x4xf32>
    %cst_25 = arith.constant 5.000000e-01 : f32
    %82 = vector.broadcast %cst_25 : f32 to vector<4x4xf32>
    %83 = arith.mulf %81, %82 : vector<4x4xf32>
    %cst_26 = arith.constant dense<0xFF800000> : vector<4xf32>
    %84 = vector.multi_reduction <maximumf>, %83, %cst_26 [1] : vector<4x4xf32> to vector<4xf32>
    %85 = vector.shape_cast %84 : vector<4xf32> to vector<4x1xf32>
    %86 = vector.broadcast %85 : vector<4x1xf32> to vector<4x4xf32>
    %87 = arith.subf %83, %86 : vector<4x4xf32>
    %88 = math.exp %87 : vector<4x4xf32>
    %cst_27 = arith.constant dense<0.000000e+00> : vector<4xf32>
    %89 = vector.multi_reduction <add>, %88, %cst_27 [1] : vector<4x4xf32> to vector<4xf32>
    %90 = vector.shape_cast %89 : vector<4xf32> to vector<4x1xf32>
    %91 = tpu.reciprocal %90 {approx = true} : vector<4x1xf32> -> vector<4x1xf32>
    %92 = vector.broadcast %91 : vector<4x1xf32> to vector<4x4xf32>
    %93 = arith.mulf %88, %92 : vector<4x4xf32>
    %94 = arith.truncf %93 : vector<4x4xf32> to vector<4x4xbf16>
    %cst_28 = arith.constant dense<0.000000e+00> : vector<4x4xf32>
    %95 = tpu.matmul %94, %80, %cst_28 {dimension_numbers = #tpu.dot_dimension_numbers<[1], [0], [0], [1], [0, 0, 1, 1], [], []>} : vector<4x4xbf16>, vector<4x4xbf16>, vector<4x4xf32> -> vector<4x4xf32>
    %96 = tpu.concatenate %32, %53, %74, %95 in 1 : vector<4x4xf32>, vector<4x4xf32>, vector<4x4xf32>, vector<4x4xf32> -> vector<4x16xf32>
    %97 = arith.truncf %96 : vector<4x16xf32> to vector<4x16xbf16>
    %c0_29 = arith.constant 0 : index
    %c0_30 = arith.constant 0 : index
    %98 = vector.load %arg5[%c0_29, %c0_30] : memref<16x16xbf16, #tpu.memory_space<vmem>>, vector<16x16xbf16>
    %cst_31 = arith.constant dense<0.000000e+00> : vector<4x16xf32>
    %99 = tpu.matmul %97, %98, %cst_31 {dimension_numbers = #tpu.dot_dimension_numbers<[1], [0], [0], [1], [0, 0, 1, 1], [], []>} : vector<4x16xbf16>, vector<16x16xbf16>, vector<4x16xf32> -> vector<4x16xf32>
    %c0_32 = arith.constant 0 : index
    %c0_33 = arith.constant 0 : index
    %100 = vector.load %arg6[%c0_32, %c0_33] : memref<1x16xf32, #tpu.memory_space<vmem>>, vector<1x16xf32>
    %101 = vector.broadcast %100 : vector<1x16xf32> to vector<4x16xf32>
    %102 = arith.addf %99, %101 : vector<4x16xf32>
    %103 = arith.truncf %102 : vector<4x16xf32> to vector<4x16xbf16>
    %c0_34 = arith.constant 0 : index
    %c0_35 = arith.constant 0 : index
    %104 = vector.load %arg7[%c0_34, %c0_35] : memref<16x16xbf16, #tpu.memory_space<vmem>>, vector<16x16xbf16>
    %cst_36 = arith.constant dense<0.000000e+00> : vector<4x16xf32>
    %105 = tpu.matmul %103, %104, %cst_36 {dimension_numbers = #tpu.dot_dimension_numbers<[1], [0], [0], [1], [0, 0, 1, 1], [], []>} : vector<4x16xbf16>, vector<16x16xbf16>, vector<4x16xf32> -> vector<4x16xf32>
    %c0_37 = arith.constant 0 : index
    %c0_38 = arith.constant 0 : index
    %106 = vector.load %arg8[%c0_37, %c0_38] : memref<1x16xf32, #tpu.memory_space<vmem>>, vector<1x16xf32>
    %107 = vector.broadcast %106 : vector<1x16xf32> to vector<4x16xf32>
    %108 = arith.addf %105, %107 : vector<4x16xf32>
    %109 = vector.extract_strided_slice %4 {offsets = [0, 0], sizes = [4, 8], strides = [1, 1]} : vector<4x16xf32> to vector<4x8xf32>
    %110 = vector.extract_strided_slice %4 {offsets = [0, 8], sizes = [4, 8], strides = [1, 1]} : vector<4x16xf32> to vector<4x8xf32>
    %111 = arith.truncf %110 : vector<4x8xf32> to vector<4x8xbf16>
    %c0_39 = arith.constant 0 : index
    %c0_40 = arith.constant 0 : index
    %112 = vector.load %arg9[%c0_39, %c0_40] : memref<8x8xbf16, #tpu.memory_space<vmem>>, vector<8x8xbf16>
    %cst_41 = arith.constant dense<0.000000e+00> : vector<4x8xf32>
    %113 = tpu.matmul %111, %112, %cst_41 {dimension_numbers = #tpu.dot_dimension_numbers<[1], [0], [0], [1], [0, 0, 1, 1], [], []>} : vector<4x8xbf16>, vector<8x8xbf16>, vector<4x8xf32> -> vector<4x8xf32>
    %c0_42 = arith.constant 0 : index
    %c0_43 = arith.constant 0 : index
    %114 = vector.load %arg10[%c0_42, %c0_43] : memref<1x8xf32, #tpu.memory_space<vmem>>, vector<1x8xf32>
    %115 = vector.broadcast %114 : vector<1x8xf32> to vector<4x8xf32>
    %116 = arith.addf %113, %115 : vector<4x8xf32>
    %117 = arith.mulf %109, %116 : vector<4x8xf32>
    %118 = arith.truncf %117 : vector<4x8xf32> to vector<4x8xbf16>
    %c0_44 = arith.constant 0 : index
    %c0_45 = arith.constant 0 : index
    %119 = vector.load %arg11[%c0_44, %c0_45] : memref<8x16xbf16, #tpu.memory_space<vmem>>, vector<8x16xbf16>
    %cst_46 = arith.constant dense<0.000000e+00> : vector<4x16xf32>
    %120 = tpu.matmul %118, %119, %cst_46 {dimension_numbers = #tpu.dot_dimension_numbers<[1], [0], [0], [1], [0, 0, 1, 1], [], []>} : vector<4x8xbf16>, vector<8x16xbf16>, vector<4x16xf32> -> vector<4x16xf32>
    %c0_47 = arith.constant 0 : index
    %c0_48 = arith.constant 0 : index
    %121 = vector.load %arg12[%c0_47, %c0_48] : memref<1x16xf32, #tpu.memory_space<vmem>>, vector<1x16xf32>
    %122 = vector.broadcast %121 : vector<1x16xf32> to vector<4x16xf32>
    %123 = arith.addf %120, %122 : vector<4x16xf32>
    %124 = arith.addf %108, %123 : vector<4x16xf32>
    %c0_49 = arith.constant 0 : index
    %c0_50 = arith.constant 0 : index
    %c0_51 = arith.constant 0 : index
    %125 = vector.load %arg13[%c0_49, %c0_50, %c0_51] : memref<1x4x16xf32, #tpu.memory_space<vmem>>, vector<1x4x16xf32>
    %126 = vector.shape_cast %125 : vector<1x4x16xf32> to vector<4x16xf32>
    %127 = vector.shape_cast %124 : vector<4x16xf32> to vector<1x4x16xf32>
    tpu.vector_store %arg13[%c0_49, %c0_50, %c0_51], %127 {strides = array<i32>} : memref<1x4x16xf32, #tpu.memory_space<vmem>>, vector<1x4x16xf32>,
    return
  }
  func.func @transform_0(%arg0: i32) -> (i32, i32, i32) {
    %c0_i32 = arith.constant 0 : i32
    %c0_i32_0 = arith.constant 0 : i32
    %c0_i32_1 = arith.constant 0 : i32
    return %arg0, %c0_i32, %c0_i32_0 : i32, i32, i32
  }
  func.func @transform_1(%arg0: i32) -> (i32, i32) {
    %c0_i32 = arith.constant 0 : i32
    %c0_i32_0 = arith.constant 0 : i32
    %c0_i32_1 = arith.constant 0 : i32
    return %c0_i32, %c0_i32_0 : i32, i32
  }
  func.func @transform_2(%arg0: i32) -> (i32, i32) {
    %c0_i32 = arith.constant 0 : i32
    %c0_i32_0 = arith.constant 0 : i32
    %c0_i32_1 = arith.constant 0 : i32
    return %c0_i32, %c0_i32_0 : i32, i32
  }
  func.func @transform_3(%arg0: i32) -> (i32, i32) {
    %c0_i32 = arith.constant 0 : i32
    %c0_i32_0 = arith.constant 0 : i32
    %c0_i32_1 = arith.constant 0 : i32
    return %c0_i32, %c0_i32_0 : i32, i32
  }
  func.func @transform_4(%arg0: i32) -> (i32, i32) {
    %c0_i32 = arith.constant 0 : i32
    %c0_i32_0 = arith.constant 0 : i32
    %c0_i32_1 = arith.constant 0 : i32
    return %c0_i32, %c0_i32_0 : i32, i32
  }
  func.func @transform_5(%arg0: i32) -> (i32, i32) {
    %c0_i32 = arith.constant 0 : i32
    %c0_i32_0 = arith.constant 0 : i32
    %c0_i32_1 = arith.constant 0 : i32
    return %c0_i32, %c0_i32_0 : i32, i32
  }
  func.func @transform_6(%arg0: i32) -> (i32, i32) {
    %c0_i32 = arith.constant 0 : i32
    %c0_i32_0 = arith.constant 0 : i32
    %c0_i32_1 = arith.constant 0 : i32
    return %c0_i32, %c0_i32_0 : i32, i32
  }
  func.func @transform_7(%arg0: i32) -> (i32, i32) {
    %c0_i32 = arith.constant 0 : i32
    %c0_i32_0 = arith.constant 0 : i32
    %c0_i32_1 = arith.constant 0 : i32
    return %c0_i32, %c0_i32_0 : i32, i32
  }
  func.func @transform_8(%arg0: i32) -> (i32, i32) {
    %c0_i32 = arith.constant 0 : i32
    %c0_i32_0 = arith.constant 0 : i32
    %c0_i32_1 = arith.constant 0 : i32
    return %c0_i32, %c0_i32_0 : i32, i32
  }
  func.func @transform_9(%arg0: i32) -> (i32, i32) {
    %c0_i32 = arith.constant 0 : i32
    %c0_i32_0 = arith.constant 0 : i32
    %c0_i32_1 = arith.constant 0 : i32
    return %c0_i32, %c0_i32_0 : i32, i32
  }
  func.func @transform_10(%arg0: i32) -> (i32, i32) {
    %c0_i32 = arith.constant 0 : i32
    %c0_i32_0 = arith.constant 0 : i32
    %c0_i32_1 = arith.constant 0 : i32
    return %c0_i32, %c0_i32_0 : i32, i32
  }
  func.func @transform_11(%arg0: i32) -> (i32, i32) {
    %c0_i32 = arith.constant 0 : i32
    %c0_i32_0 = arith.constant 0 : i32
    %c0_i32_1 = arith.constant 0 : i32
    return %c0_i32, %c0_i32_0 : i32, i32
  }
  func.func @transform_12(%arg0: i32) -> (i32, i32, i32) {
    %c0_i32 = arith.constant 0 : i32
    %c0_i32_0 = arith.constant 0 : i32
    %c0_i32_1 = arith.constant 0 : i32
    return %arg0, %c0_i32, %c0_i32_0 : i32, i32, i32
  }
}

</mosaic_0001>

<bundles_post_ra>
// kernel: tpu_custom_call.1
= control target key start
LH: loop header
LB: loop body
LE: loop exit
PB: predicated region body
PF: predicated region fallthrough
CT: control target
= control target key end

     0   :  { %s2539_s0 = inlined_call_operand.hbm [shape: bf16[6,4,16], index: 0, kind: input, shape index: {}]   ;;  %s2540_s1 = inlined_call_operand.hbm [shape: bf16[16,16], index: 1, kind: input, shape index: {}]   ;;  %s2541_s2 = inlined_call_operand.hbm [shape: bf16[16,48], index: 2, kind: input, shape index: {}]   ;;  %s2542_s3 = inlined_call_operand.hbm [shape: f32[1,48], index: 3, kind: input, shape index: {}]   ;;  %s2543_s4 = inlined_call_operand.hbm [shape: bf16[16,16], index: 4, kind: input, shape index: {}]   ;;  %s2544_s5 = inlined_call_operand.hbm [shape: f32[1,16], index: 5, kind: input, shape index: {}]   ;;  %s2545_s6 = inlined_call_operand.vmem [shape: bf16[16,16], index: 6, kind: input, shape index: {}]   ;;  %s2546_s7 = inlined_call_operand.hbm [shape: f32[1,16], index: 7, kind: input, shape index: {}]   ;;  %s2547_s8 = inlined_call_operand.vmem [shape: bf16[8,8], index: 8, kind: input, shape index: {}]   ;;  %s2548_s9 = inlined_call_operand.hbm [shape: f32[1,8], index: 9, kind: input, shape index: {}]   ;;  %s2549_s10 = inlined_call_operand.vmem [shape: bf16[8,16], index: 10, kind: input, shape index: {}]   ;;  %s2550_s11 = inlined_call_operand.vmem [shape: f32[1,16], index: 11, kind: input, shape index: {}]   ;;  %s2551_s12 = inlined_call_operand.hbm [shape: f32[6,4,16], index: 12, kind: output, shape index: {}]  }
   0x1   :  { %2559 = sst [smem:[#allocation23_spill]] %s2540_s1 }
   0x2   :  { %2560 = sst [smem:[#allocation24_spill]] %s2541_s2 }
   0x3   :  { %2561 = sst [smem:[#allocation25_spill]] %s2542_s3 }
   0x4   :  { %2562 = sst [smem:[#allocation26_spill]] %s2543_s4 }
   0x5   :  { %2563 = sst [smem:[#allocation27_spill]] %s2544_s5 }
   0x6   :  { %2564 = sst [smem:[#allocation28_spill]] %s2546_s7 }
   0x7   :  { %2565 = sst [smem:[#allocation29_spill]] %s2551_s12 }
   0x8   :  { %17 = vsyncpa [#allocation3], 0 }
   0x9   :  { %19 = vsyncpa [#allocation3 + $0x1], 0 }
   0xa   :  { %20 = vsyncpa [#allocation6], 0 }
   0xb   :  { %21 = vsyncpa [#allocation9], 0 }
   0xc   :  { %22 = vsyncpa [#allocation12], 0 }
   0xd   :  { %23 = vsyncpa [#allocation15], 0 }
   0xe   :  { %24 = vsyncpa [#allocation4], 0 }
   0xf   :  { %26 = vsyncpa [#allocation4 + $0x1], 0  ;;  %s2189_s21 = smov 0   ;;  %s2191_s22 = smov 0  }
  0x10   :  { %s2193_s23 = smov 0   ;;  %s2195_s24 = smov 0  }
  0x11 LB: > { %s2097_s25 = smov [#allocation5]   ;;  %s2210_s27 = sadd.s32 4294967295, %s2095_s24   ;;  %s2095_s24 = sphi %s2195_s24, %s2597_s24   ;;  %s2091_s23 = sphi %s2193_s23, %s2596_s23   ;;  %s2087_s22 = sphi %s2191_s22, %s2595_s22   ;;  %s2083_s21 = sphi %s2189_s21, %s2594_s21  }
  0x12   : > { %s332_s26 = sshll.u32 %s2097_s25, 4  ;;  %p1490_p0 = scmp.ge.s32.totalorder %s2095_s24, 1  ;;  %s333_s26 = int_to_ptr.vmem [resolvable:$true] %s332_s26 }
  0x13   : > { %p2555_p1 = scmp.eq.s32.totalorder %s2210_s27, 0  ;;  %p320_p2 = scmp.lt.s32.totalorder %s2095_s24, 7 }
  0x14   : > { %s2098_s29 = smov [#allocation8]   ;;  %s2099_s14 = smov [#allocation11]  }
  0x15   : > { %p2215_p3 = pnand %p1490_p0, %p320_p2  ;;  %s359_s30 = sshll.u32 %s2098_s29, 4  ;;  %s360_s30 = int_to_ptr.vmem [resolvable:$true] %s359_s30 }
  0x16   : > { %s383_s15 = sshll.u32 %s2099_s14, 4  ;;  %s1816_s17 = scalar_lea.vmem %s333_s26, 128  ;;  %s2227_s15 = int_to_ptr.vmem [resolvable:$true] %s383_s15 }
  0x17   : > { %s2566_s28 = scalar_select %p2215_p3, 1, 0 }
  0x18   : > { %p1682_p4 = pneg %p2215_p3  ;;  %p1817_p7 = scmp.ne.s32.totalorder %s333_s26, %s1816_s17 }
  0x19   : > { %p1824_p10 = scmp.lt.s32.totalorder %s333_s26, %s333_s26  ;;  %p1825_p11 = scmp.lt.s32.totalorder %s1816_s17, %s1816_s17 }
  0x1a   : > { %p2223_p5 = pnand %p1682_p4, %p2555_p1 }
  0x1b   : > { %p1826_p12 = por %p1825_p11, %p1824_p10 }
  0x1c   : > { %p2231_p6 = pneg %p2223_p5 }
  0x1e   : > { %p1819_p8 = pnand %p1817_p7, %p2231_p6 }
  0x20   : > { %p1820_p9 = pneg %p1819_p8 }
  0x22   : > { %p1827_p13 = pnand %p1826_p12, %p1820_p9 }
  0x24   : > { %1830 = shalt.err (!%p1827_p13)
}
  0x25   : > { %s2553_s18 = smov 64   ;;  %s2101_s19 = smov 4  }
  0x26   : > { %s2569_s1 = sld [smem:[#allocation23_spill]]  ;;  %s1842_s29 = scalar_lea.vmem %s360_s30, 16 }
  0x27   : > { %p1843_p0 = scmp.ne.s32.totalorder %s360_s30, %s1842_s29  ;;  %s1849_s14 = scalar_lea.vmem %s360_s30, 32 }
  0x28   : > { %p1850_p7 = scmp.lt.s32.totalorder %s360_s30, %s360_s30  ;;  %p1851_p8 = scmp.lt.s32.totalorder %s1849_s14, %s1842_s29 }
  0x29   : > { %p1845_p2 = pnand %p1843_p0, %p2231_p6 }
  0x2a   : > { %p1852_p9 = por %p1851_p8, %p1850_p7 }
  0x2b   : > { %p1846_p4 = pneg %p1845_p2 }
  0x2c   : > { %1685 = dma.hbm_to_vmem [thread:$0]  (!%p2223_p5), %s2569_s1, 128, %s333_s26, [#allocation6], %s2553_s18, %s2553_s18, %s2101_s19  }
  0x2d   : > { %p1853_p10 = pnand %p1852_p9, %p1846_p4 }
  0x2f   : > { %1856 = shalt.err (!%p1853_p10)
}
  0x30   : > { %s2570_s3 = sld [smem:[#allocation25_spill]]  ;;  %s1868_s26 = scalar_lea.vmem %s2227_s15, 16 }
  0x31   : > { %p1869_p11 = scmp.ne.s32.totalorder %s2227_s15, %s1868_s26  ;;  %s1875_s20 = scalar_lea.vmem %s2227_s15, 32 }
  0x32   : > { %p1876_p0 = scmp.lt.s32.totalorder %s2227_s15, %s2227_s15  ;;  %p1877_p2 = scmp.lt.s32.totalorder %s1875_s20, %s1868_s26 }
  0x33   : > { %p1871_p12 = pnand %p1869_p11, %p2231_p6 }
  0x34   : > { %p1878_p4 = por %p1877_p2, %p1876_p0 }
  0x35   : > { %p1872_p13 = pneg %p1871_p12 }
  0x36   : > { %1691 = dma.hbm_to_vmem [thread:$0]  (!%p2223_p5), %s2570_s3, 16, %s360_s30, [#allocation9]  }
  0x37   : > { %p1879_p7 = pnand %p1878_p4, %p1872_p13 }
  0x39   : > { %1882 = shalt.err (!%p1879_p7)
}
  0x3a   : > { %s2571_s5 = sld [smem:[#allocation27_spill]]  ;;  %s2102_s30 = smov [#allocation7]  }
  0x3b   : > { %s345_s29 = sshll.u32 %s2102_s30, 4  ;;  %s2103_s14 = smov [#allocation10]   ;;  %s346_s29 = int_to_ptr.vmem [resolvable:$true] %s345_s29 }
  0x3c   : > { %s369_s17 = sshll.u32 %s2103_s14, 4  ;;  %s1894_s18 = scalar_lea.vmem %s346_s29, 128  ;;  %s370_s17 = int_to_ptr.vmem [resolvable:$true] %s369_s17 }
  0x3d   : > { %p1895_p8 = scmp.ne.s32.totalorder %s346_s29, %s1894_s18  ;;  %p1902_p11 = scmp.lt.s32.totalorder %s346_s29, %s346_s29 }
  0x3e   : > { %p1903_p12 = scmp.lt.s32.totalorder %s1894_s18, %s1894_s18 }
  0x3f   : > { %p1897_p9 = pnand %p1895_p8, %p2231_p6 }
  0x40   : > { %1697 = dma.hbm_to_vmem [thread:$0]  (!%p2223_p5), %s2571_s5, 16, %s2227_s15, [#allocation12]  }
  0x41   : > { %p1898_p10 = pneg %p1897_p9  ;;  %p1904_p13 = por %p1903_p12, %p1902_p11 }
  0x43   : > { %p1905_p0 = pnand %p1904_p13, %p1898_p10 }
  0x45   : > { %1908 = shalt.err (!%p1905_p0)
}
  0x46   : > { %s2572_s26 = smov 64   ;;  %s2573_s2 = sld [smem:[#allocation24_spill]] }
  0x47   : > { %s1920_s12 = scalar_lea.vmem %s370_s17, 128  ;;  %p1928_p8 = scmp.lt.s32.totalorder %s370_s17, %s370_s17 }
  0x48   : > { %p1921_p2 = scmp.ne.s32.totalorder %s370_s17, %s1920_s12  ;;  %p1929_p9 = scmp.lt.s32.totalorder %s1920_s12, %s1920_s12 }
  0x4a   : > { %p1923_p4 = pnand %p1921_p2, %p2231_p6  ;;  %p1930_p10 = por %p1929_p9, %p1928_p8 }
  0x4c   : > { %1688 = dma.hbm_to_vmem [thread:$0]  (!%p2223_p5), %s2573_s2, 128, %s346_s29, [#allocation6], %s2572_s26, %s2572_s26, %s2101_s19  }
  0x4d   : > { %p1924_p7 = pneg %p1923_p4 }
  0x4f   : > { %p1931_p11 = pnand %p1930_p10, %p1924_p7 }
  0x51   : > { %1934 = shalt.err (!%p1931_p11)
}
  0x52   : > { %s2574_s4 = sld [smem:[#allocation26_spill]]  ;;  %s2104_s30 = smov [#allocation13]  }
  0x53   : > { %s397_s29 = sshll.u32 %s2104_s30, 4  ;;  %s2105_s14 = smov [#allocation14]   ;;  %s398_s29 = int_to_ptr.vmem [resolvable:$true] %s397_s29 }
  0x54   : > { %s411_s15 = sshll.u32 %s2105_s14, 4  ;;  %s1946_s20 = scalar_lea.vmem %s398_s29, 16  ;;  %s412_s15 = int_to_ptr.vmem [resolvable:$true] %s411_s15 }
  0x55   : > { %p1947_p12 = scmp.ne.s32.totalorder %s398_s29, %s1946_s20  ;;  %s1953_s12 = scalar_lea.vmem %s398_s29, 32 }
  0x56   : > { %p1954_p2 = scmp.lt.s32.totalorder %s398_s29, %s398_s29  ;;  %p1955_p4 = scmp.lt.s32.totalorder %s1953_s12, %s1946_s20 }
  0x57   : > { %p1949_p13 = pnand %p1947_p12, %p2231_p6 }
  0x58   : > { %1694 = dma.hbm_to_vmem [thread:$0]  (!%p2223_p5), %s2574_s4, 128, %s370_s17, [#allocation9], %s2572_s26, %s2572_s26, %s2101_s19  }
  0x59   : > { %p1950_p0 = pneg %p1949_p13  ;;  %p1956_p7 = por %p1955_p4, %p1954_p2 }
  0x5b   : > { %p1957_p8 = pnand %p1956_p7, %p1950_p0 }
  0x5d   : > { %1960 = shalt.err (!%p1957_p8)
}
  0x5e   : > { %s2575_s7 = sld [smem:[#allocation28_spill]]  ;;  %s1972_s17 = scalar_lea.vmem %s412_s15, 16 }
  0x5f   : > { %p1973_p9 = scmp.ne.s32.totalorder %s412_s15, %s1972_s17  ;;  %s1979_s26 = scalar_lea.vmem %s412_s15, 32 }
  0x60   : > { %p1980_p12 = scmp.lt.s32.totalorder %s412_s15, %s412_s15  ;;  %p1981_p13 = scmp.lt.s32.totalorder %s1979_s26, %s1972_s17 }
  0x61   : > { %p1975_p10 = pnand %p1973_p9, %p2231_p6 }
  0x62   : > { %p1982_p1 = por %p1981_p13, %p1980_p12 }
  0x63   : > { %p1976_p11 = pneg %p1975_p10 }
  0x64   : > { %1700 = dma.hbm_to_vmem [thread:$0]  (!%p2223_p5), %s2575_s7, 16, %s398_s29, [#allocation12]  }
  0x65   : > { %p1983_p2 = pnand %p1982_p1, %p1976_p11 }
  0x67   : > { %1986 = shalt.err (!%p1983_p2)
}
  0x68   : > { %1703 = dma.hbm_to_vmem [thread:$0]  (!%p2223_p5), %s2548_s9, 16, %s412_s15, [#allocation15]  }
  0x69   : > { %s1489_s16 = sadd.s32 4294967294, %s2095_s24   ;;  %s2301_s13 = sadd.s32 1, %s2095_s24  }
  0x6a   : > { %s39_s29 = sadd.s32 1, %s2091_s23  ;;  %s36_s14 = ssub.s32 %s2095_s24, %s2301_s13 }
  0x6b   : > { %p46_p1 = scmp.ne.s32.totalorder %s2091_s23, %s2087_s22  ;;  %p37_p6 = scmp.eq.s32.totalorder %s36_s14, 0 }
  0x6c   : > { %p47_p0 = scmp.eq.s32.totalorder %s2095_s24, 0  ;;  %p52_p4 = scmp.ne.s32.totalorder %s2087_s22, %s2083_s21 }
  0x6d   : > { %p307_p7 = scmp.eq.s32.totalorder %s2210_s27, 5  ;;  %p2576_p9 = scmp.eq.s32.totalorder %s2210_s27, 0 }
  0x6e   : > { %s2313_s20 = scalar_select %p37_p6, %s2091_s23, %s39_s29  }
  0x6f   : > { %p48_p8 = por %p47_p0, %p46_p1  ;;  %p2317_p10 = por %p2576_p9, %p52_p4 }
  0x70   : > { %p2321_p5 = por %p307_p7, %p46_p1  ;;  %p313_p11 = scmp.eq.s32.totalorder %s1489_s16, 5 }
  0x71   : > { %s2577_s12 = scalar_select %p2317_p10, 1, 0 }
  0x72   : > { %s2578_s15 = scalar_select %p2321_p5, 1, 0 }
  0x73   : > { %p1719_p12 = scmp.lt.s32.totalorder %s2095_s24, 6  ;;  %s428_s18 = sand.u32 1, %s2091_s23  }
  0x74   : > { %p2327_p13 = por %p313_p11, %p52_p4  ;;  %s1499_s17 = sshll.u32 %s428_s18, 1 }
  0x75   : > { %s1500_s26 = sshll.u32 %s2095_s24, 5  ;;  %s432_s14 = scalar_lea.vmem [#allocation2], %s1499_s17 }
  0x76   : > { %s2579_s19 = scalar_select %p2327_p13, 1, 0 }
  0x77   : > { %s2335_s29 = scalar_lea.hbm %s2539_s0, %s1500_s26  ;;  %s439_s1 = sshll.u32 %s432_s14, 4  ;;  %s440_s1 = int_to_ptr.vmem [resolvable:$true] %s439_s1 }
  0x78   : > { %p2337_p2 = pnand %p1719_p12, %p48_p8  ;;  %s429_s2 = scalar_lea.sflag [#allocation3], %s428_s18 }
  0x79   : > { %s1987_s3 = scalar_lea.hbm %s2335_s29, 32  ;;  %s1992_s30 = scalar_lea.hbm %s2539_s0, 192 }
  0x7a   : > { %p1988_p1 = scmp.ne.s32.totalorder %s2335_s29, %s1987_s3  ;;  %p1989_p6 = pneg %p2337_p2 }
  0x7b   : > { %p1993_p7 = scmp.lt.s32.totalorder %s2335_s29, %s2539_s0  ;;  %p1994_p8 = scmp.lt.s32.totalorder %s1992_s30, %s1987_s3 }
  0x7c   : > { %p1990_p0 = pnand %p1989_p6, %p1988_p1 }
  0x7d   : > { %p1995_p9 = por %p1994_p8, %p1993_p7 }
  0x7e   : > { %p1991_p4 = pneg %p1990_p0 }
  0x80   : > { %p1996_p11 = pnand %p1995_p9, %p1991_p4 }
  0x82   : > { %1999 = shalt.err (!%p1996_p11)
}
  0x83   : > { %s2000_s14 = scalar_lea.vmem %s440_s1, 32  ;;  %s2106_s18 = smov [#allocation2]  }
  0x84   : > { %p2001_p12 = scmp.ne.s32.totalorder %s440_s1, %s2000_s14  ;;  %s2005_s5 = sshll.u32 %s2106_s18, 4  ;;  %s2006_s5 = int_to_ptr.vmem [resolvable:$false] %s2005_s5 }
  0x85   : > { %s2007_s7 = scalar_lea.vmem %s2006_s5, 64  ;;  %p2008_p1 = scmp.lt.s32.totalorder %s440_s1, %s2006_s5 }
  0x86   : > { %p2003_p13 = pnand %p2001_p12, %p1989_p6  ;;  %p2009_p0 = scmp.lt.s32.totalorder %s2007_s7, %s2000_s14 }
  0x88   : > { %p2004_p5 = pneg %p2003_p13  ;;  %p2010_p10 = por %p2009_p0, %p2008_p1 }
  0x8a   : > { %p2011_p3 = pnand %p2010_p10, %p2004_p5 }
  0x8c   : > { %2014 = shalt.err (!%p2011_p3)
}
  0x8d   : > { %1707 = dma.hbm_to_vmem [thread:$0]  (!%p2337_p2), %s2335_s29, 32, %s440_s1, %s429_s2  }
  0x8e   : > { %p2581_p4 = scmp.ne.s32.totalorder %s2566_s28, 0 }
  0x8f   : > { %s2358_s3 = sand.u32 (!%p2581_p4), 1, %s2087_s22   ;;  %p2582_p13 = scmp.ne.s32.totalorder (!%p2581_p4), %s2577_s12, 0 }
  0x90   : > { %448 = sbr.rel (%p2581_p4) target bundleno = 1985 (0x7c1), region = 68  ;;  %s1502_s4 = sshll.u32 (!%p2581_p4), %s2358_s3, 1 }
  0x91   : > { %s451_s26 = scalar_lea.sflag (!%p2581_p4), [#allocation3], %s2358_s3  ;;  %s454_s5 = scalar_lea.vmem (!%p2581_p4), [#allocation2], %s1502_s4 }
  0x95   : > { %2058 = dma.done.wait (%p2582_p13), %s451_s26, 32  }
  0x96   : > { %2060 = vsyncadd (%p2582_p13), %s451_s26, 4294967264  ;;  %p2583_p3 = scmp.eq.s32.totalorder %s2210_s27, 0 }
  0x98   : > { %2062 = dma.done.wait (%p2583_p3), [#allocation6], 256   ;;  %p2584_p10 = pmov %p2583_p3 }
  0x99   : > { %p2585_p5 = pmov %p2583_p3 }
  0x9a   : > { %2064 = vsyncadd (%p2584_p10), [#allocation6], 4294967040 }
  0x9b   : > { %2066 = dma.done.wait (%p2585_p5), [#allocation9], 144   ;;  %p2586_p2 = pmov %p2583_p3 }
  0x9d   : > { %2068 = vsyncadd (%p2586_p2), [#allocation9], 4294967152  ;;  %p2587_p6 = pmov %p2586_p2 }
  0x9e   : > { %p2588_p7 = pmov %p2586_p2 }
  0x9f   : > { %2070 = dma.done.wait (%p2587_p6), [#allocation12], 32  }
  0xa0   : > { %2072 = vsyncadd (%p2588_p7), [#allocation12], 4294967264  ;;  %p2589_p8 = pmov %p2586_p2 }
  0xa1   : > { %p2590_p9 = pmov %p2586_p2 }
  0xa2   : > { %2074 = dma.done.wait (%p2589_p8), [#allocation15], 16  }
  0xa3   : > { %2076 = vsyncadd (%p2590_p9), [#allocation15], 4294967280  ;;  %v2107_v0 = vmov 0.0   ;;  %vm2108_vm0 = vmmov 0   ;;  %v1785_v1 = vld [vmem:[#allocation5] sm:$0xff]   ;;  %vm534_vm1 = vcmask 130048  }
  0xa4   : > { %1566 = vmatprep.subr.bf16.mxu0 %v2107_v0  ;;  %1568 = vmatprep.mubr.msk.bf16.mxu0 %vm2108_vm0, %v2107_v0  ;;  %v524_v2 = vld [vmem:[%s454_s5] sm:$0x3]  ;;  %v1786_v3 = vld [vmem:[#allocation7] sm:$0xff]   ;;  %v1513_v11 = vld [vmem:[#allocation8] ss:$0 sm:$0xff]  ;;  %s2109_s1 = smov 124  }
  0xa5   : > { %1572 = vmatprep.subr.bf16.mxu1 %v2107_v0  ;;  %1574 = vmatprep.mubr.msk.bf16.mxu1 %vm2108_vm0, %v2107_v0  ;;  %v525_v4 = vunpack.c.l.bf16 %v524_v2  ;;  %s2110_s2 = smov 112   ;;  %s2111_s7 = smov 104   ;;  %vm642_vm2 = vcmask 31744   ;;  %vm690_vm3 = vcmask 27648   ;;  %vm708_vm4 = vcmask 1041408  }
  0xa6   : > { %1567 = vmatpush3.bf16.msra.mxu0 %v1785_v1  ;;  %1573 = vmatpush3.bf16.msra.mxu1 %v1786_v3  ;;  %s2112_s28 = smov 108   ;;  %s2113_s12 = smov 100   ;;  %vm1098_vm5 = vcmask 64512   ;;  %vm1100_vm6 = vcmask 97280   ;;  %vm1235_vm7 = vcmask 1043456   ;;  %vm1336_vm8 = vcmask 125952  }
  0xa7   : > { %1578 = vmatprep.subr.bf16.mxu0 %v2107_v0  ;;  %1584 = vmatprep.subr.bf16.mxu1 %v2107_v0  ;;  %s2114_s29 = smov 120   ;;  %s2115_s16 = smov 116  }
  0xa8   : > { %s2116_s25 = smov 92   ;;  %s2117_s30 = smov 96  }
  0xa9   : > { %1569 = vmatmul.mubr.msk.bf16.vlgmr.msra.gmra.mxu0 %vm534_vm1, %v524_v2  ;;  %s2118_s17 = smov 84   ;;  %s2119_s14 = smov 88  }
  0xaa   : > { %1580 = vmatprep.mubr.msk.bf16.mxu0 %vm2108_vm0, %v2107_v0  ;;  %s2120_s18 = smov 4   ;;  %s2121_s4 = smov 8  }
  0xab   : > { %s2122_s26 = smov 12   ;;  %p2592_p12 = scmp.ne.s32.totalorder %s2578_s15, 0 }
 0x169   : > { %v2393_v5 = vpop.f32.mrf.mxu0 }
 0x16a   : > { %v578_v6 = vsub.f32 %v525_v4, %v2393_v5 }
 0x16b   : > { %v1570_v7 = vpop.f32.mrf.mxu0 }
 0x16c   : > { %v579_v8 = vpack.c.bf16 %v578_v6, %v578_v6 }
 0x16d   : > { %v575_v9 = vpop.f32.mrf.mxu0 }
 0x16e   : > { %1575 = vmatmul.mubr.msk.bf16.vlgmr.msra.gmra.mxu1 %vm534_vm1, %v579_v8 }
 0x16f   : > { %v1571_v10 = vpop.f32.mrf.mxu0  ;;  %1586 = vmatprep.mubr.msk.bf16.mxu1 %vm2108_vm0, %v2107_v0 }
 0x22e   : > { %v632_v12 = vpop.f32.mrf.mxu1 }
 0x22f   : > { %v633_v13 = vadd.f32 %v1513_v11, %v632_v12 }
 0x230   : > { %v1576_v14 = vpop.f32.mrf.mxu1 }
 0x231   : > { %v2399_v15 = vpack.c.bf16 %v633_v13, %v633_v13 }
 0x232   : > { %v635_v16 = vpop.f32.mrf.mxu1 }
 0x233   : > { %752 = vrot.lane.b32.xlu1 %v2399_v15, %s2109_s1  ;;  %640 = vrot.lane.b32.xlu0 %v2399_v15, %s2110_s2  ;;  %s2123_s2 = smov [#allocation16]  }
 0x234   : > { %v1577_v17 = vpop.f32.mrf.mxu1 }
 0x237   : > { %865 = vrot.lane.b32.xlu1 %v2399_v15, %s2111_s7  ;;  %754 = vrot.lane.b32.xlu0 %v2399_v15, %s2112_s28  ;;  %s2019_s7 = sshll.u32 %s2123_s2, 4  ;;  %s2020_s7 = int_to_ptr.vmem [resolvable:$false] %s2019_s7 }
 0x238   : > { %s2021_s28 = scalar_lea.vmem %s2020_s7, 128 }
 0x23b   : > { %976 = vrot.lane.b32.xlu1 %v2399_v15, %s2113_s12  ;;  %863 = vrot.lane.b32.xlu0 %v2399_v15, %s2114_s29 }
 0x23f   : > { %974 = vrot.lane.b32.xlu0 %v2399_v15, %s2115_s16 }
 0x2a5   : > { %v641_v18 = vpop.permute.xlu0 %640  ;;  %v753_v21 = vpop.permute.xlu1 %752 }
 0x2a6   : > { %v647_v19 = vsel %vm642_vm2, %v641_v18, 0 }
 0x2a7   : > { %1579 = vmatpush3.bf16.xpose.msra.mxu0 %v647_v19 }
 0x2a8   : > { %1590 = vmatprep.subr.bf16.mxu0 %v2107_v0 }
 0x2a9   : > { %v755_v20 = vpop.permute.xlu0 %754  ;;  %v866_v23 = vpop.permute.xlu1 %865 }
 0x2aa   : > { %v760_v22 = vsel %vm642_vm2, %v755_v20, 0  ;;  %v871_v24 = vsel %vm642_vm2, %v866_v23, 0 }
 0x2ad   : > { %v977_v25 = vpop.permute.xlu1 %976  ;;  %v864_v26 = vpop.permute.xlu0 %863 }
 0x2ae   : > { %1581 = vmatmul.mubr.msk.bf16.vlgmr.msra.gmra.mxu0 %vm642_vm2, %v2399_v15  ;;  %v982_v27 = vsel %vm642_vm2, %v977_v25, 0 }
 0x2af   : > { %1591 = vmatpush3.bf16.xpose.msra.mxu0 %v760_v22  ;;  %1592 = vmatprep.mubr.msk.bf16.mxu0 %vm2108_vm0, %v2107_v0 }
 0x2b0   : > { %1602 = vmatprep.subr.bf16.mxu0 %v2107_v0 }
 0x2b1   : > { %v975_v28 = vpop.permute.xlu0 %974 }
 0x2b6   : > { %1593 = vmatmul.mubr.msk.bf16.vlgmr.msra.gmra.mxu0 %vm642_vm2, %v753_v21 }
 0x2b7   : > { %1603 = vmatpush3.bf16.xpose.msra.mxu0 %v871_v24  ;;  %1604 = vmatprep.mubr.msk.bf16.mxu0 %vm2108_vm0, %v2107_v0 }
 0x2b8   : > { %1614 = vmatprep.subr.bf16.mxu0 %v2107_v0 }
 0x2be   : > { %1605 = vmatmul.mubr.msk.bf16.vlgmr.msra.gmra.mxu0 %vm642_vm2, %v864_v26 }
 0x2bf   : > { %1615 = vmatpush3.bf16.xpose.msra.mxu0 %v982_v27  ;;  %1616 = vmatprep.mubr.msk.bf16.mxu0 %vm2108_vm0, %v2107_v0 }
 0x2c0   : > { %1626 = vmatprep.subr.bf16.mxu0 %v2107_v0 }
 0x2c6   : > { %1617 = vmatmul.mubr.msk.bf16.vlgmr.msra.gmra.mxu0 %vm642_vm2, %v975_v28 }
 0x2c7   : > { %1628 = vmatprep.mubr.msk.bf16.mxu0 %vm2108_vm0, %v2107_v0 }
 0x36e   : > { %v683_v29 = vpop.f32.mrf.mxu0 }
 0x36f   : > { %v689_v30 = vmul.f32 0.5, %v683_v29 }
 0x370   : > { %v1582_v31 = vpop.f32.mrf.mxu0 }
 0x371   : > { %v691_v32 = vsel %vm690_vm3, %v689_v30, -inf }
 0x372   : > { %692 = vmax.xlane.f32.xlu1 %v691_v32  ;;  %v686_v33 = vpop.f32.mrf.mxu0 }
 0x374   : > { %v1583_v34 = vpop.f32.mrf.mxu0 }
 0x376   : > { %v796_v35 = vpop.f32.mrf.mxu0 }
 0x377   : > { %v802_v36 = vmul.f32 0.5, %v796_v35 }
 0x378   : > { %v1594_v37 = vpop.f32.mrf.mxu0 }
 0x379   : > { %v803_v38 = vsel %vm690_vm3, %v802_v36, -inf }
 0x37a   : > { %804 = vmax.xlane.f32.xlu0 %v803_v38  ;;  %v799_v39 = vpop.f32.mrf.mxu0 }
 0x37c   : > { %v1595_v40 = vpop.f32.mrf.mxu0 }
 0x37e   : > { %v907_v41 = vpop.f32.mrf.mxu0 }
 0x37f   : > { %v913_v42 = vmul.f32 0.5, %v907_v41 }
 0x380   : > { %v1606_v43 = vpop.f32.mrf.mxu0 }
 0x381   : > { %v914_v44 = vsel %vm690_vm3, %v913_v42, -inf  ;;  %v1787_v43 = vld [vmem:[#allocation10] sm:$0xff]  }
 0x382   : > { %915 = vmax.xlane.f32.xlu0 %v914_v44  ;;  %v910_v45 = vpop.f32.mrf.mxu0  ;;  %1627 = vmatpush3.bf16.msra.mxu0 %v1787_v43 }
 0x383   : > { %1638 = vmatprep.subr.bf16.mxu0 %v2107_v0 }
 0x384   : > { %v1607_v46 = vpop.f32.mrf.mxu0 }
 0x385   : > { %v1220_v46 = vpack.c.bf16 %v2393_v5, %v2393_v5 }
 0x386   : > { %v1018_v47 = vpop.f32.mrf.mxu0 }
 0x387   : > { %v1024_v48 = vmul.f32 0.5, %v1018_v47 }
 0x388   : > { %v1618_v49 = vpop.f32.mrf.mxu0 }
 0x389   : > { %v1025_v50 = vsel %vm690_vm3, %v1024_v48, -inf }
 0x38a   : > { %1026 = vmax.xlane.f32.xlu1 %v1025_v50  ;;  %v1021_v51 = vpop.f32.mrf.mxu0 }
 0x38c   : > { %v1619_v52 = vpop.f32.mrf.mxu0 }
 0x3fb   : > { %v693_v53 = vpop.xlane.xlu1 %692 }
 0x3fc   : > { %v694_v54 = vsub.f32 %v689_v30, %v693_v53 }
 0x3fe   : > { %v695_v55 = vmul.f32 1.442695, %v694_v54 }
 0x400   : > { %1789 = vpow2.f32 %v695_v55 }
 0x403   : > { %v805_v56 = vpop.xlane.xlu0 %804 }
 0x404   : > { %v806_v57 = vsub.f32 %v802_v36, %v805_v56  ;;  %v1221_v56 = vld [vmem:[%s2547_s8] sm:$0xf] }
 0x406   : > { %v807_v58 = vmul.f32 1.442695, %v806_v57 }
 0x408   : > { %1791 = vpow2.f32 %v807_v58 }
 0x40b   : > { %v916_v59 = vpop.xlane.xlu0 %915 }
 0x40c   : > { %v917_v60 = vsub.f32 %v913_v42, %v916_v59 }
 0x40d   : > { %v1790_v61 = vpop.eup %1789 }
 0x40e   : > { %v918_v62 = vmul.f32 1.442695, %v917_v60  ;;  %v697_v63 = vsel %vm690_vm3, %v1790_v61, 0.0 }
 0x40f   : > { %698 = vadd.xlane.f32.xlu0 %v697_v63  ;;  %v1788_v63 = vld [vmem:[%s2545_s6] sm:$0xff]  }
 0x410   : > { %1793 = vpow2.f32 %v918_v62 }
 0x413   : > { %v1027_v6 = vpop.xlane.xlu1 %1026 }
 0x414   : > { %v1028_v7 = vsub.f32 %v1024_v48, %v1027_v6 }
 0x415   : > { %v1792_v1 = vpop.eup %1791 }
 0x416   : > { %v809_v2 = vsel %vm690_vm3, %v1792_v1, 0.0  ;;  %v1029_v8 = vmul.f32 1.442695, %v1028_v7 }
 0x417   : > { %810 = vadd.xlane.f32.xlu1 %v809_v2 }
 0x418   : > { %1795 = vpow2.f32 %v1029_v8 }
 0x41d   : > { %v1794_v3 = vpop.eup %1793 }
 0x41e   : > { %v920_v4 = vsel %vm690_vm3, %v1794_v3, 0.0 }
 0x41f   : > { %921 = vadd.xlane.f32.xlu0 %v920_v4 }
 0x425   : > { %v1796_v9 = vpop.eup %1795 }
 0x426   : > { %v1031_v10 = vsel %vm690_vm3, %v1796_v9, 0.0 }
 0x428   : > { %815 = vrot.lane.b32.xlu1 %v2399_v15, %s2116_s25 }
 0x435   : > { %703 = vrot.lane.b32.xlu0 %v2399_v15, %s2117_s30  ;;  %s1535_s30 = sshll.u32 %s2210_s27, 6  ;;  %s1339_s27 = scalar_lea.sflag [#allocation4], %s2358_s3 }
 0x439   : > { %1037 = vrot.lane.b32.xlu0 %v2399_v15, %s2118_s17 }
 0x44c   : > { %1032 = vadd.xlane.f32.xlu1 %v1031_v10 }
 0x45d   : > { %926 = vrot.lane.b32.xlu1 %v2399_v15, %s2119_s14 }
 0x498   : > { %v699_v11 = vpop.xlane.xlu0 %698 }
 0x499   : > { %1797 = vrcp.f32 %v699_v11  ;;  %v1530_v11 = vld [vmem:[#allocation14] ss:$0 sm:$0xff] }
 0x4a0   : > { %v811_v12 = vpop.xlane.xlu1 %810 }
 0x4a1   : > { %1799 = vrcp.f32 %v811_v12 }
 0x4a4   : > { %v816_v19 = vpop.permute.xlu1 %815 }
 0x4a5   : > { %v821_v22 = vsel %vm708_vm4, %v816_v19, 0 }
 0x4a6   : > { %v1798_v13 = vpop.eup %1797 }
 0x4a7   : > { %v701_v16 = vmul.f32 %v1798_v13, %v1790_v61  ;;  %v1237_v61 = vsel %vm1235_vm7, %v1221_v56, 0 }
 0x4a8   : > { %v922_v14 = vpop.xlane.xlu0 %921 }
 0x4a9   : > { %v702_v20 = vpack.c.bf16 %v701_v16, %v701_v16  ;;  %1801 = vrcp.f32 %v922_v14 }
 0x4ac   : > { %v704_v17 = vpop.permute.xlu0 %703 }
 0x4ad   : > { %v710_v18 = vsel %vm708_vm4, %v704_v17, 0 }
 0x4ae   : > { %1585 = vmatpush3.bf16.msra.mxu1 %v710_v18  ;;  %v1800_v21 = vpop.eup %1799 }
 0x4af   : > { %1596 = vmatprep.subr.bf16.mxu1 %v2107_v0  ;;  %v813_v15 = vmul.f32 %v1800_v21, %v1792_v1  ;;  %v1524_v1 = vld [vmem:[#allocation11] ss:$0 sm:$0xff] }
 0x4b0   : > { %v1038_v29 = vpop.permute.xlu0 %1037 }
 0x4b1   : > { %1587 = vmatmul.mubr.msk.bf16.vlgmr.msra.gmra.mxu1 %vm642_vm2, %v702_v20  ;;  %v814_v23 = vpack.c.bf16 %v813_v15, %v813_v15  ;;  %v1043_v31 = vsel %vm708_vm4, %v1038_v29, 0 }
 0x4b2   : > { %1597 = vmatpush3.bf16.msra.mxu1 %v821_v22  ;;  %1598 = vmatprep.mubr.msk.bf16.mxu1 %vm2108_vm0, %v2107_v0 }
 0x4b3   : > { %1608 = vmatprep.subr.bf16.mxu1 %v2107_v0 }
 0x4b6   : > { %v1802_v24 = vpop.eup %1801 }
 0x4b7   : > { %v924_v26 = vmul.f32 %v1802_v24, %v1794_v3  ;;  %v1281_v3 = vld [vmem:[%s2549_s10] sm:$0xf] }
 0x4b8   : > { %v1293_v8 = vsel %vm1235_vm7, %v1281_v3, 0 }
 0x4b9   : > { %1599 = vmatmul.mubr.msk.bf16.vlgmr.msra.gmra.mxu1 %vm642_vm2, %v814_v23  ;;  %v925_v30 = vpack.c.bf16 %v924_v26, %v924_v26  ;;  %v1527_v23 = vld [vmem:[#allocation13] ss:$0 sm:$0xff] }
 0x4ba   : > { %1610 = vmatprep.mubr.msk.bf16.mxu1 %vm2108_vm0, %v2107_v0 }
 0x4d5   : > { %v1033_v25 = vpop.xlane.xlu1 %1032 }
 0x4d6   : > { %1803 = vrcp.f32 %v1033_v25 }
 0x4d9   : > { %v927_v27 = vpop.permute.xlu1 %926 }
 0x4da   : > { %v932_v28 = vsel %vm708_vm4, %v927_v27, 0 }
 0x4db   : > { %1609 = vmatpush3.bf16.msra.mxu1 %v932_v28 }
 0x4dc   : > { %1620 = vmatprep.subr.bf16.mxu1 %v2107_v0 }
 0x4de   : > { %1611 = vmatmul.mubr.msk.bf16.vlgmr.msra.gmra.mxu1 %vm642_vm2, %v925_v30 }
 0x4df   : > { %1621 = vmatpush3.bf16.msra.mxu1 %v1043_v31  ;;  %1622 = vmatprep.mubr.msk.bf16.mxu1 %vm2108_vm0, %v2107_v0 }
 0x4e0   : > { %1632 = vmatprep.subr.bf16.mxu1 %v2107_v0 }
 0x4e3   : > { %v1804_v32 = vpop.eup %1803 }
 0x4e4   : > { %v1035_v33 = vmul.f32 %v1804_v32, %v1796_v9 }
 0x4e6   : > { %v1036_v34 = vpack.c.bf16 %v1035_v33, %v1035_v33 }
 0x4e8   : > { %1623 = vmatmul.mubr.msk.bf16.vlgmr.msra.gmra.mxu1 %vm642_vm2, %v1036_v34 }
 0x4e9   : > { %1634 = vmatprep.mubr.msk.bf16.mxu1 %vm2108_vm0, %v2107_v0  ;;  %1633 = vmatpush3.bf16.msra.mxu1 %v1788_v63 }
 0x4ea   : > { %1644 = vmatprep.subr.bf16.mxu1 %v2107_v0 }
 0x571   : > { %v746_v35 = vpop.f32.mrf.mxu1 }
 0x573   : > { %v1588_v36 = vpop.f32.mrf.mxu1 }
 0x575   : > { %v749_v37 = vpop.f32.mrf.mxu1 }
 0x577   : > { %v1589_v38 = vpop.f32.mrf.mxu1 }
 0x579   : > { %v857_v39 = vpop.f32.mrf.mxu1 }
 0x57a   : > { %1086 = vrot.lane.b32.xlu1 %v857_v39, %s2120_s18 }
 0x57b   : > { %v1600_v40 = vpop.f32.mrf.mxu1 }
 0x57d   : > { %v860_v41 = vpop.f32.mrf.mxu1 }
 0x57f   : > { %v1601_v42 = vpop.f32.mrf.mxu1 }
 0x59e   : > { %v968_v44 = vpop.f32.mrf.mxu1 }
 0x59f   : > { %1090 = vrot.lane.b32.xlu0 %v968_v44, %s2121_s4 }
 0x5a0   : > { %v1612_v45 = vpop.f32.mrf.mxu1 }
 0x5a2   : > { %v971_v47 = vpop.f32.mrf.mxu1 }
 0x5a3   : > { %1230 = vrot.lane.b32.xlu0 %v1220_v46, %s2114_s29  ;;  %s1510_s29 = sshll.u32 %s2358_s3, 2 }
 0x5a4   : > { %v1613_v48 = vpop.f32.mrf.mxu1  ;;  %s522_s17 = scalar_lea.vmem [#allocation16], %s1510_s29 }
 0x5a5   : > { %s1352_s14 = sshll.u32 %s522_s17, 4  ;;  %s2499_s14 = int_to_ptr.vmem [resolvable:$true] %s1352_s14 }
 0x5a6   : > { %s2015_s1 = scalar_lea.vmem %s2499_s14, 64  ;;  %p2022_p4 = scmp.lt.s32.totalorder %s2499_s14, %s2020_s7 }
 0x5a7   : > { %p2016_p11 = scmp.ne.s32.totalorder %s2499_s14, %s2015_s1  ;;  %p2023_p13 = scmp.lt.s32.totalorder %s2021_s28, %s2015_s1 }
 0x5a8   : > { %v1079_v49 = vpop.f32.mrf.mxu1 }
 0x5a9   : > { %1094 = vrot.lane.b32.xlu1 %v1079_v49, %s2122_s26  ;;  %s2591_s26 = sld [smem:[#allocation29_spill]]  ;;  %p2017_p1 = pnand %p2016_p11, %p2592_p12 }
 0x5aa   : > { %v1624_v50 = vpop.f32.mrf.mxu1  ;;  %p2024_p3 = por %p2023_p13, %p2022_p4 }
 0x5ab   : > { %p2018_p0 = pneg %p2017_p1 }
 0x5ac   : > { %v1082_v51 = vpop.f32.mrf.mxu1 }
 0x5ad   : > { %p2025_p10 = pnand %p2024_p3, %p2018_p0 }
 0x5ae   : > { %v1625_v52 = vpop.f32.mrf.mxu1 }
 0x5af   : > { %s2497_s5 = scalar_lea.hbm %s2591_s26, %s1535_s30 }
 0x5ec   : > { %v1087_v53 = vpop.permute.xlu1 %1086 }
 0x5ed   : > { %v1097_v55 = vsel %vm642_vm2, %v746_v35, %v1087_v53 }
 0x611   : > { %v1091_v54 = vpop.permute.xlu0 %1090 }
 0x612   : > { %v1099_v57 = vsel %vm1098_vm5, %v1097_v55, %v1091_v54 }
 0x615   : > { %v1231_v62 = vpop.permute.xlu0 %1230 }
 0x61b   : > { %v1095_v58 = vpop.permute.xlu1 %1094 }
 0x61c   : > { %v1101_v59 = vsel %vm1100_vm6, %v1099_v57, %v1095_v58 }
 0x61d   : > { %v1102_v60 = vpack.c.bf16 %v1101_v59, %v1101_v59 }
 0x61f   : > { %1629 = vmatmul.mubr.msk.bf16.vlgmr.msra.gmra.mxu0 %vm534_vm1, %v1102_v60 }
 0x620   : > { %1639 = vmatpush3.bf16.msra.mxu0 %v1237_v61  ;;  %1640 = vmatprep.mubr.msk.bf16.mxu0 %vm2108_vm0, %v2107_v0 }
 0x627   : > { %1641 = vmatmul.mubr.msk.bf16.vlgmr.msra.gmra.mxu0 %vm1098_vm5, %v1231_v62 }
 0x6df   : > { %v1155_v2 = vpop.f32.mrf.mxu0 }
 0x6e0   : > { %v1156_v4 = vadd.f32 %v1524_v1, %v1155_v2 }
 0x6e1   : > { %v1630_v6 = vpop.f32.mrf.mxu0 }
 0x6e2   : > { %v1161_v7 = vpack.c.bf16 %v1156_v4, %v1156_v4 }
 0x6e3   : > { %v1158_v9 = vpop.f32.mrf.mxu0 }
 0x6e4   : > { %1635 = vmatmul.mubr.msk.bf16.vlgmr.msra.gmra.mxu1 %vm534_vm1, %v1161_v7 }
 0x6e5   : > { %v1631_v10 = vpop.f32.mrf.mxu0  ;;  %1645 = vmatpush3.bf16.msra.mxu1 %v1293_v8  ;;  %1646 = vmatprep.mubr.msk.bf16.mxu1 %vm2108_vm0, %v2107_v0  ;;  %v1532_v0 = vld [vmem:[%s2550_s11] ss:$0 sm:$0xff] }
 0x6e7   : > { %v1273_v12 = vpop.f32.mrf.mxu0 }
 0x6e8   : > { %v1274_v13 = vadd.f32 %v1530_v11, %v1273_v12 }
 0x6e9   : > { %v1642_v14 = vpop.f32.mrf.mxu0 }
 0x6ea   : > { %v1279_v16 = vmul.f32 %v1274_v13, %v2393_v5 }
 0x6eb   : > { %v1276_v17 = vpop.f32.mrf.mxu0 }
 0x6ec   : > { %v1280_v18 = vpack.c.bf16 %v1279_v16, %v1279_v16 }
 0x6ed   : > { %v1643_v19 = vpop.f32.mrf.mxu0 }
 0x6ee   : > { %1647 = vmatmul.mubr.msk.bf16.vlgmr.msra.gmra.mxu1 %vm1098_vm5, %v1280_v18 }
 0x7a4   : > { %v1214_v20 = vpop.f32.mrf.mxu1 }
 0x7a5   : > { %v1215_v5 = vadd.f32 %v1527_v23, %v1214_v20 }
 0x7a6   : > { %v1636_v21 = vpop.f32.mrf.mxu1 }
 0x7a8   : > { %v1217_v22 = vpop.f32.mrf.mxu1 }
 0x7aa   : > { %v1637_v15 = vpop.f32.mrf.mxu1 }
 0x7ae   : > { %v1329_v24 = vpop.f32.mrf.mxu1 }
 0x7af   : > { %v1330_v25 = vadd.f32 %v1532_v0, %v1329_v24 }
 0x7b0   : > { %v1648_v26 = vpop.f32.mrf.mxu1 }
 0x7b1   : > { %v1335_v27 = vadd.f32 %v1330_v25, %v1215_v5 }
 0x7b2   : > { %v1332_v28 = vpop.f32.mrf.mxu1 }
 0x7b3   : > { %1337 = vst.msk [vmem:[%s522_s17] sm:$0xf] %vm1336_vm8, %v1335_v27 }
 0x7b4   : > { %v1649_v29 = vpop.f32.mrf.mxu1 }
 0x7b5   : > { %2028 = shalt.err (!%p2025_p10)
}
 0x7b6   : > { %s2029_s12 = scalar_lea.hbm %s2497_s5, 64  ;;  %s2033_s16 = scalar_lea.hbm %s2591_s26, 384 }
 0x7b7   : > { %p2030_p5 = scmp.ne.s32.totalorder %s2497_s5, %s2029_s12  ;;  %p2034_p7 = scmp.lt.s32.totalorder %s2497_s5, %s2591_s26 }
 0x7b8   : > { %p2035_p8 = scmp.lt.s32.totalorder %s2033_s16, %s2029_s12 }
 0x7b9   : > { %p2031_p2 = pnand %p2030_p5, %p2592_p12 }
 0x7ba   : > { %p2036_p9 = por %p2035_p8, %p2034_p7 }
 0x7bb   : > { %p2032_p6 = pneg %p2031_p2 }
 0x7bd   : > { %p2037_p11 = pnand %p2036_p9, %p2032_p6 }
 0x7bf   : > { %2040 = shalt.err (!%p2037_p11)
}
 0x7c0   : > { %1680 = dma.vmem_to_hbm [thread:$0]  (%p2592_p12), %s2499_s14, 64, %s2497_s5, %s1339_s27  }
 0x7c1 PF: > { %p1727_p1 = scmp.ge.s32.totalorder %s2095_s24, 2  ;;  %s1364_s17 = sand.u32 1, %s2083_s21  }
 0x7c2   : > { %p2593_p0 = scmp.ne.s32.totalorder %s2579_s19, 0  ;;  %s1365_s18 = scalar_lea.sflag [#allocation4], %s1364_s17 }
 0x7c4   : > { %p1709_p4 = pnand %p1727_p1, %p2593_p0 }
 0x7c6   : > { %p1710_p13 = pneg %p1709_p4 }
 0x7c8   : > { %2078 = dma.done.wait (%p1710_p13), %s1365_s18, 64  }
 0x7c9   : > { %2080 = vsyncadd (%p1710_p13), %s1365_s18, 4294967232  ;;  %p29_p3 = scmp.ge.s32.totalorder %s2301_s13, 8   ;;  %s2594_s21 = smov %s2087_s22 }
 0x7ca   : > { %s2595_s22 = smov %s2091_s23  ;;  %s2596_s23 = smov %s2313_s20 }
 0x7cb   : > { %s2597_s24 = smov %s2301_s13  ;;  %31 = sbr.rel (!%p29_p3) target bundleno = 17 (0x11), region = 141 }
 0x7d0   :  { %1370 = vsyncpa [#allocation3], 1 }
 0x7d1   :  { %1372 = vsyncpa [#allocation3 + $0x1], 1 }
 0x7d2   :  { %1373 = vsyncpa [#allocation6], 1 }
 0x7d3   :  { %1374 = vsyncpa [#allocation9], 1 }
 0x7d4   :  { %1375 = vsyncpa [#allocation12], 1 }
 0x7d5   :  { %1376 = vsyncpa [#allocation15], 1 }
 0x7d6   :  { %1377 = vsyncpa [#allocation4], 1 }
 0x7d7   :  { %1379 = vsyncpa [#allocation4 + $0x1], 1 }

</bundles_post_ra>
